<compile_context>
chip_gen: v6e
topology: v6e:2x2x1
jax: 0.10.0
libtpu: 0.0.40
codegen_flags: <defaults>
</compile_context>

<pallas_src>
import functools

import jax
import jax.numpy as jnp
from jax.experimental import pallas as pl
from jax.experimental.pallas import tpu as pltpu


def _round_up(x, m):
    return ((x + m - 1) // m) * m


def _mlp_kernel(x_ref,
                w1_ref, b1_ref,
                w2_ref, b2_ref,
                w3_ref, b3_ref,
                w4_ref, b4_ref,
                w5_ref, b5_ref,
                o_ref,
                *, out_range):
    # x is already bf16 (pre-cast in the wrapper); accumulate in f32 on the MXU,
    # do bias/ReLU/sigmoid in f32 on the VPU/EUP.
    h = x_ref[...]

    h = jnp.dot(h, w1_ref[...], preferred_element_type=jnp.float32) + b1_ref[...]
    h = jnp.maximum(h, 0.0).astype(jnp.bfloat16)      # ReLU (dropout = identity, eval)

    h = jnp.dot(h, w2_ref[...], preferred_element_type=jnp.float32) + b2_ref[...]
    h = jnp.maximum(h, 0.0).astype(jnp.bfloat16)

    h = jnp.dot(h, w3_ref[...], preferred_element_type=jnp.float32) + b3_ref[...]
    h = jnp.maximum(h, 0.0).astype(jnp.bfloat16)      # padded lanes stay exactly 0

    h = jnp.dot(h, w4_ref[...], preferred_element_type=jnp.float32) + b4_ref[...]
    h = jnp.maximum(h, 0.0).astype(jnp.bfloat16)      # padded lanes stay exactly 0

    h = jnp.dot(h, w5_ref[...], preferred_element_type=jnp.float32) + b5_ref[...]
    o_ref[...] = jax.nn.sigmoid(h) * out_range        # padded lanes sliced off outside


def prepare_params(params):
    """One-time parameter prep (hoisted out of the hot path).

    * Weights -> bf16 (MXU-native); biases -> f32 rows (1, out).
    * Hidden widths below 128 are zero-padded to 128 lanes; the next layer's K
      dim is padded to match.  Zero weights/biases + ReLU keep padded lanes 0.
    * Last layer padded to 128 output lanes for a lane-dense store.
    * The 10-wide input K dim of layer 1 is NOT padded (keeps input DMA cheap).

    Returns (flat_args, d_out) where d_out is the true output width.
    """
    d_out = params[-1][0].shape[1]
    flat_args = []
    k_pad = params[0][0].shape[0]          # never pad the HBM input dim
    for (w, b) in params:
        k, n = w.shape
        n_pad = n if n >= 128 else 128
        if (k_pad, n_pad) == (k, n):
            wp = w.astype(jnp.bfloat16)
            bp = b.reshape(1, -1).astype(jnp.float32)
        else:
            wp = jnp.zeros((k_pad, n_pad), jnp.bfloat16).at[:k, :n].set(
                w.astype(jnp.bfloat16))
            bp = jnp.zeros((1, n_pad), jnp.float32).at[:, :n].set(
                b.reshape(1, -1).astype(jnp.float32))
        flat_args.append(wp)
        flat_args.append(bp)
        k_pad = n_pad                      # next layer consumes the padded width
    return tuple(flat_args), d_out


def net_forward(x, flat_args, *, out_range, d_out, tb=None):
    """x: (B, input_dim) float32.  flat_args: output of prepare_params()."""
    B, D_in = x.shape
    D_out_pad = flat_args[-1].shape[1]     # lane-dense padded output width (128)

    # --- batch tile ------------------------------------------------------
    # Big tiles amortize the ~0.35 us/step grid overhead; keep >=2 grid steps
    # when the batch allows so the "parallel" axis uses both TCs on v7x.
    if tb is None:
        B8 = _round_up(B, 8)
        if B8 <= 8:
            tb = B8
        else:
            steps = max(2, pl.cdiv(B8, 1024))
            tb = _round_up(pl.cdiv(B8, steps), 8)
    Bp = _round_up(B, tb)

    # Pre-cast the input to bf16 (halves input DMA; first dot consumes bf16).
    x = x.astype(jnp.bfloat16)
    if Bp != B:
        x = jnp.pad(x, ((0, Bp - B), (0, 0)))

    # --- specs -------------------------------------------------------------
    grid = (Bp // tb,)
    x_spec = pl.BlockSpec((tb, D_in), lambda i: (i, 0))
    # Full-array blocks, constant index_map -> weights/biases stay VMEM-resident
    # across the batch loop.
    param_specs = [pl.BlockSpec(a.shape, lambda i: (0, 0)) for a in flat_args]
    out_spec = pl.BlockSpec((tb, D_out_pad), lambda i: (i, 0))

    kernel = functools.partial(_mlp_kernel, out_range=float(out_range))

    out = pl.pallas_call(
        kernel,
        out_shape=jax.ShapeDtypeStruct((Bp, D_out_pad), jnp.float32),
        grid=grid,
        in_specs=[x_spec] + param_specs,
        out_specs=out_spec,
        compiler_params=pltpu.CompilerParams(
            dimension_semantics=("parallel",)),
    )(x, *flat_args)

    # Slice off batch/lane padding (fused by XLA when net_forward is jitted).
    return out[:B, :d_out]


def _init_linear(key, fan_in, fan_out):
    # Mimics PyTorch nn.Linear default init: U(-1/sqrt(fan_in), 1/sqrt(fan_in)).
    kw, kb = jax.random.split(key)
    bound = 1.0 / jnp.sqrt(fan_in)
    w = jax.random.uniform(kw, (fan_in, fan_out), jnp.float32, -bound, bound)
    b = jax.random.uniform(kb, (fan_out,), jnp.float32, -bound, bound)
    return w, b


if __name__ == "__main__":
    input_dim = 10
    out_range = 5.0
    batch = 16                       # small, but still exercises a 2-step batch grid

    key = jax.random.PRNGKey(0)
    keys = jax.random.split(key, 6)

    dims = [input_dim, 512, 256, 64, 32, input_dim]
    params = [_init_linear(keys[i], dims[i], dims[i + 1]) for i in range(5)]

    x = jax.random.normal(keys[5], (batch, input_dim), dtype=jnp.float32)

    flat_args, d_out = prepare_params(params)          # one-time prep (hoisted)
    fwd = jax.jit(functools.partial(net_forward, out_range=out_range, d_out=d_out))
    y = jax.block_until_ready(fwd(x, flat_args))

    # Reference in plain JAX (eval-mode dropout == identity) with the same
    # bf16-operand / f32-accumulate numerics contract as the kernel.
    # NOTE: vs. a pure-f32 PyTorch forward, expect ~0.4% relative deviation
    # from bf16 weights/activations on the MXU.
    h = x
    for i, (w, b) in enumerate(params):
        h = jnp.dot(h.astype(jnp.bfloat16), w.astype(jnp.bfloat16),
                    preferred_element_type=jnp.float32) + b
        if i < 4:
            h = jnp.maximum(h, 0.0)
    ref = jax.nn.sigmoid(h) * out_range

    assert y.shape == (batch, input_dim)
    assert jnp.allclose(y, ref, atol=1e-3, rtol=1e-3), "mismatch vs. JAX reference"

    print("KERNEL_OK")
</pallas_src>

<mosaic_0001>
module attributes {stable_mosaic.version = 11 : i64} {
  func.func @_mlp_kernel(%arg0: i32, %arg1: memref<8x10xbf16, #tpu.memory_space<vmem>>, %arg2: memref<10x512xbf16, #tpu.memory_space<vmem>>, %arg3: memref<1x512xf32, #tpu.memory_space<vmem>>, %arg4: memref<512x256xbf16, #tpu.memory_space<vmem>>, %arg5: memref<1x256xf32, #tpu.memory_space<vmem>>, %arg6: memref<256x128xbf16, #tpu.memory_space<vmem>>, %arg7: memref<1x128xf32, #tpu.memory_space<vmem>>, %arg8: memref<128x128xbf16, #tpu.memory_space<vmem>>, %arg9: memref<1x128xf32, #tpu.memory_space<vmem>>, %arg10: memref<128x128xbf16, #tpu.memory_space<vmem>>, %arg11: memref<1x128xf32, #tpu.memory_space<vmem>>, %arg12: memref<8x128xf32, #tpu.memory_space<vmem>>) attributes {dimension_semantics = [#tpu.dimension_semantics<parallel>], iteration_bounds = array<i64: 2>, scalar_prefetch = 0 : i64, scratch_operands = 0 : i64, tpu.core_type = #tpu.core_type<tc>, window_params = [{transform_indices = @transform_0, window_bounds = array<i64: 8, 10>}, {pipeline_mode = #tpu.pipeline_mode<synchronous>, transform_indices = @transform_1, window_bounds = array<i64: 10, 512>}, {pipeline_mode = #tpu.pipeline_mode<synchronous>, transform_indices = @transform_2, window_bounds = array<i64: 1, 512>}, {pipeline_mode = #tpu.pipeline_mode<synchronous>, transform_indices = @transform_3, window_bounds = array<i64: 512, 256>}, {pipeline_mode = #tpu.pipeline_mode<synchronous>, transform_indices = @transform_4, window_bounds = array<i64: 1, 256>}, {pipeline_mode = #tpu.pipeline_mode<synchronous>, transform_indices = @transform_5, window_bounds = array<i64: 256, 128>}, {pipeline_mode = #tpu.pipeline_mode<synchronous>, transform_indices = @transform_6, window_bounds = array<i64: 1, 128>}, {pipeline_mode = #tpu.pipeline_mode<synchronous>, transform_indices = @transform_7, window_bounds = array<i64: 128, 128>}, {pipeline_mode = #tpu.pipeline_mode<synchronous>, transform_indices = @transform_8, window_bounds = array<i64: 1, 128>}, {pipeline_mode = #tpu.pipeline_mode<synchronous>, transform_indices = @transform_9, window_bounds = array<i64: 128, 128>}, {pipeline_mode = #tpu.pipeline_mode<synchronous>, transform_indices = @transform_10, window_bounds = array<i64: 1, 128>}, {transform_indices = @transform_11, window_bounds = array<i64: 8, 128>}]} {
    %c0 = arith.constant 0 : index
    %c0_0 = arith.constant 0 : index
    %0 = vector.load %arg1[%c0, %c0_0] : memref<8x10xbf16, #tpu.memory_space<vmem>>, vector<8x10xbf16>
    %c0_1 = arith.constant 0 : index
    %c0_2 = arith.constant 0 : index
    %1 = vector.load %arg2[%c0_1, %c0_2] : memref<10x512xbf16, #tpu.memory_space<vmem>>, vector<10x512xbf16>
    %cst = arith.constant dense<0.000000e+00> : vector<8x512xf32>
    %2 = tpu.matmul %0, %1, %cst {dimension_numbers = #tpu.dot_dimension_numbers<[1], [0], [0], [1], [0, 0, 1, 1], [], []>} : vector<8x10xbf16>, vector<10x512xbf16>, vector<8x512xf32> -> vector<8x512xf32>
    %c0_3 = arith.constant 0 : index
    %c0_4 = arith.constant 0 : index
    %3 = vector.load %arg3[%c0_3, %c0_4] : memref<1x512xf32, #tpu.memory_space<vmem>>, vector<1x512xf32>
    %4 = vector.broadcast %3 : vector<1x512xf32> to vector<8x512xf32>
    %5 = arith.addf %2, %4 : vector<8x512xf32>
    %cst_5 = arith.constant 0.000000e+00 : f32
    %6 = vector.broadcast %cst_5 : f32 to vector<8x512xf32>
    %7 = arith.maximumf %5, %6 : vector<8x512xf32>
    %8 = arith.truncf %7 : vector<8x512xf32> to vector<8x512xbf16>
    %c0_6 = arith.constant 0 : index
    %c0_7 = arith.constant 0 : index
    %9 = vector.load %arg4[%c0_6, %c0_7] : memref<512x256xbf16, #tpu.memory_space<vmem>>, vector<512x256xbf16>
    %cst_8 = arith.constant dense<0.000000e+00> : vector<8x256xf32>
    %10 = tpu.matmul %8, %9, %cst_8 {dimension_numbers = #tpu.dot_dimension_numbers<[1], [0], [0], [1], [0, 0, 1, 1], [], []>} : vector<8x512xbf16>, vector<512x256xbf16>, vector<8x256xf32> -> vector<8x256xf32>
    %c0_9 = arith.constant 0 : index
    %c0_10 = arith.constant 0 : index
    %11 = vector.load %arg5[%c0_9, %c0_10] : memref<1x256xf32, #tpu.memory_space<vmem>>, vector<1x256xf32>
    %12 = vector.broadcast %11 : vector<1x256xf32> to vector<8x256xf32>
    %13 = arith.addf %10, %12 : vector<8x256xf32>
    %cst_11 = arith.constant 0.000000e+00 : f32
    %14 = vector.broadcast %cst_11 : f32 to vector<8x256xf32>
    %15 = arith.maximumf %13, %14 : vector<8x256xf32>
    %16 = arith.truncf %15 : vector<8x256xf32> to vector<8x256xbf16>
    %c0_12 = arith.constant 0 : index
    %c0_13 = arith.constant 0 : index
    %17 = vector.load %arg6[%c0_12, %c0_13] : memref<256x128xbf16, #tpu.memory_space<vmem>>, vector<256x128xbf16>
    %cst_14 = arith.constant dense<0.000000e+00> : vector<8x128xf32>
    %18 = tpu.matmul %16, %17, %cst_14 {dimension_numbers = #tpu.dot_dimension_numbers<[1], [0], [0], [1], [0, 0, 1, 1], [], []>} : vector<8x256xbf16>, vector<256x128xbf16>, vector<8x128xf32> -> vector<8x128xf32>
    %c0_15 = arith.constant 0 : index
    %c0_16 = arith.constant 0 : index
    %19 = vector.load %arg7[%c0_15, %c0_16] : memref<1x128xf32, #tpu.memory_space<vmem>>, vector<1x128xf32>
    %20 = vector.broadcast %19 : vector<1x128xf32> to vector<8x128xf32>
    %21 = arith.addf %18, %20 : vector<8x128xf32>
    %cst_17 = arith.constant 0.000000e+00 : f32
    %22 = vector.broadcast %cst_17 : f32 to vector<8x128xf32>
    %23 = arith.maximumf %21, %22 : vector<8x128xf32>
    %24 = arith.truncf %23 : vector<8x128xf32> to vector<8x128xbf16>
    %c0_18 = arith.constant 0 : index
    %c0_19 = arith.constant 0 : index
    %25 = vector.load %arg8[%c0_18, %c0_19] : memref<128x128xbf16, #tpu.memory_space<vmem>>, vector<128x128xbf16>
    %cst_20 = arith.constant dense<0.000000e+00> : vector<8x128xf32>
    %26 = tpu.matmul %24, %25, %cst_20 {dimension_numbers = #tpu.dot_dimension_numbers<[1], [0], [0], [1], [0, 0, 1, 1], [], []>} : vector<8x128xbf16>, vector<128x128xbf16>, vector<8x128xf32> -> vector<8x128xf32>
    %c0_21 = arith.constant 0 : index
    %c0_22 = arith.constant 0 : index
    %27 = vector.load %arg9[%c0_21, %c0_22] : memref<1x128xf32, #tpu.memory_space<vmem>>, vector<1x128xf32>
    %28 = vector.broadcast %27 : vector<1x128xf32> to vector<8x128xf32>
    %29 = arith.addf %26, %28 : vector<8x128xf32>
    %cst_23 = arith.constant 0.000000e+00 : f32
    %30 = vector.broadcast %cst_23 : f32 to vector<8x128xf32>
    %31 = arith.maximumf %29, %30 : vector<8x128xf32>
    %32 = arith.truncf %31 : vector<8x128xf32> to vector<8x128xbf16>
    %c0_24 = arith.constant 0 : index
    %c0_25 = arith.constant 0 : index
    %33 = vector.load %arg10[%c0_24, %c0_25] : memref<128x128xbf16, #tpu.memory_space<vmem>>, vector<128x128xbf16>
    %cst_26 = arith.constant dense<0.000000e+00> : vector<8x128xf32>
    %34 = tpu.matmul %32, %33, %cst_26 {dimension_numbers = #tpu.dot_dimension_numbers<[1], [0], [0], [1], [0, 0, 1, 1], [], []>} : vector<8x128xbf16>, vector<128x128xbf16>, vector<8x128xf32> -> vector<8x128xf32>
    %c0_27 = arith.constant 0 : index
    %c0_28 = arith.constant 0 : index
    %35 = vector.load %arg11[%c0_27, %c0_28] : memref<1x128xf32, #tpu.memory_space<vmem>>, vector<1x128xf32>
    %36 = vector.broadcast %35 : vector<1x128xf32> to vector<8x128xf32>
    %37 = arith.addf %34, %36 : vector<8x128xf32>
    %38 = arith.negf %37 : vector<8x128xf32>
    %39 = math.exp %38 : vector<8x128xf32>
    %cst_29 = arith.constant 1.000000e+00 : f32
    %40 = vector.broadcast %cst_29 : f32 to vector<8x128xf32>
    %41 = arith.addf %40, %39 : vector<8x128xf32>
    %42 = arith.divf %40, %41 : vector<8x128xf32>
    %cst_30 = arith.constant 5.000000e+00 : f32
    %43 = vector.broadcast %cst_30 : f32 to vector<8x128xf32>
    %44 = arith.mulf %42, %43 : vector<8x128xf32>
    %c0_31 = arith.constant 0 : index
    %c0_32 = arith.constant 0 : index
    %45 = vector.load %arg12[%c0_31, %c0_32] : memref<8x128xf32, #tpu.memory_space<vmem>>, vector<8x128xf32>
    tpu.vector_store %arg12[%c0_31, %c0_32], %44 {strides = array<i32>} : memref<8x128xf32, #tpu.memory_space<vmem>>, vector<8x128xf32>,
    return
  }
  func.func @transform_0(%arg0: i32) -> (i32, i32) {
    %c0_i32 = arith.constant 0 : i32
    %c0_i32_0 = arith.constant 0 : i32
    return %arg0, %c0_i32 : i32, i32
  }
  func.func @transform_1(%arg0: i32) -> (i32, i32) {
    %c0_i32 = arith.constant 0 : i32
    %c0_i32_0 = arith.constant 0 : i32
    %c0_i32_1 = arith.constant 0 : i32
    return %c0_i32, %c0_i32_0 : i32, i32
  }
  func.func @transform_2(%arg0: i32) -> (i32, i32) {
    %c0_i32 = arith.constant 0 : i32
    %c0_i32_0 = arith.constant 0 : i32
    %c0_i32_1 = arith.constant 0 : i32
    return %c0_i32, %c0_i32_0 : i32, i32
  }
  func.func @transform_3(%arg0: i32) -> (i32, i32) {
    %c0_i32 = arith.constant 0 : i32
    %c0_i32_0 = arith.constant 0 : i32
    %c0_i32_1 = arith.constant 0 : i32
    return %c0_i32, %c0_i32_0 : i32, i32
  }
  func.func @transform_4(%arg0: i32) -> (i32, i32) {
    %c0_i32 = arith.constant 0 : i32
    %c0_i32_0 = arith.constant 0 : i32
    %c0_i32_1 = arith.constant 0 : i32
    return %c0_i32, %c0_i32_0 : i32, i32
  }
  func.func @transform_5(%arg0: i32) -> (i32, i32) {
    %c0_i32 = arith.constant 0 : i32
    %c0_i32_0 = arith.constant 0 : i32
    %c0_i32_1 = arith.constant 0 : i32
    return %c0_i32, %c0_i32_0 : i32, i32
  }
  func.func @transform_6(%arg0: i32) -> (i32, i32) {
    %c0_i32 = arith.constant 0 : i32
    %c0_i32_0 = arith.constant 0 : i32
    %c0_i32_1 = arith.constant 0 : i32
    return %c0_i32, %c0_i32_0 : i32, i32
  }
  func.func @transform_7(%arg0: i32) -> (i32, i32) {
    %c0_i32 = arith.constant 0 : i32
    %c0_i32_0 = arith.constant 0 : i32
    %c0_i32_1 = arith.constant 0 : i32
    return %c0_i32, %c0_i32_0 : i32, i32
  }
  func.func @transform_8(%arg0: i32) -> (i32, i32) {
    %c0_i32 = arith.constant 0 : i32
    %c0_i32_0 = arith.constant 0 : i32
    %c0_i32_1 = arith.constant 0 : i32
    return %c0_i32, %c0_i32_0 : i32, i32
  }
  func.func @transform_9(%arg0: i32) -> (i32, i32) {
    %c0_i32 = arith.constant 0 : i32
    %c0_i32_0 = arith.constant 0 : i32
    %c0_i32_1 = arith.constant 0 : i32
    return %c0_i32, %c0_i32_0 : i32, i32
  }
  func.func @transform_10(%arg0: i32) -> (i32, i32) {
    %c0_i32 = arith.constant 0 : i32
    %c0_i32_0 = arith.constant 0 : i32
    %c0_i32_1 = arith.constant 0 : i32
    return %c0_i32, %c0_i32_0 : i32, i32
  }
  func.func @transform_11(%arg0: i32) -> (i32, i32) {
    %c0_i32 = arith.constant 0 : i32
    %c0_i32_0 = arith.constant 0 : i32
    return %arg0, %c0_i32 : i32, i32
  }
}

</mosaic_0001>

<bundles_post_ra>
// kernel: net_forward.1
= control target key start
LH: loop header
LB: loop body
LE: loop exit
PB: predicated region body
PF: predicated region fallthrough
CT: control target
= control target key end

     0   :  { %16 = vsyncpa [#allocation3], 0  ;;  %s2557_s0 = inlined_call_operand.vmem [shape: bf16[16,10], index: 0, kind: input, shape index: {}]   ;;  %s2558_s1 = inlined_call_operand.hbm [shape: bf16[10,512], index: 1, kind: input, shape index: {}]   ;;  %s2559_s2 = inlined_call_operand.vmem [shape: f32[1,512], index: 2, kind: input, shape index: {}]   ;;  %s2560_s3 = inlined_call_operand.hbm [shape: bf16[512,256], index: 3, kind: input, shape index: {}]   ;;  %s2561_s4 = inlined_call_operand.vmem [shape: f32[1,256], index: 4, kind: input, shape index: {}]   ;;  %s2562_s5 = inlined_call_operand.hbm [shape: bf16[256,128], index: 5, kind: input, shape index: {}]   ;;  %s2563_s6 = inlined_call_operand.vmem [shape: f32[1,128], index: 6, kind: input, shape index: {}]   ;;  %s2564_s7 = inlined_call_operand.hbm [shape: bf16[128,128], index: 7, kind: input, shape index: {}]   ;;  %s2565_s8 = inlined_call_operand.vmem [shape: f32[1,128], index: 8, kind: input, shape index: {}]   ;;  %s2566_s9 = inlined_call_operand.hbm [shape: bf16[128,128], index: 9, kind: input, shape index: {}]   ;;  %s2567_s10 = inlined_call_operand.vmem [shape: f32[1,128], index: 10, kind: input, shape index: {}]   ;;  %s2568_s11 = inlined_call_operand.hbm [shape: f32[16,128], index: 11, kind: output, shape index: {}]  }
   0x1   :  { %17 = vsyncpa [#allocation6], 0 }
   0x2   :  { %18 = vsyncpa [#allocation9], 0 }
   0x3   :  { %19 = vsyncpa [#allocation4], 0 }
   0x4   :  { %21 = vsyncpa [#allocation4 + $0x1], 0  ;;  %s2344_s17 = smov 0   ;;  %s2346_s18 = smov 0  }
   0x5   :  { %s2348_s19 = smov 0   ;;  %s2350_s20 = smov 0  }
   0x6 LB: > { %2578 = sst [smem:[#allocation16_spill]] %s2263_s19  ;;  %s2365_s21 = sadd.s32 4294967295, %s2267_s20   ;;  %s2267_s20 = sphi %s2350_s20, %s2596_s20   ;;  %s2263_s19 = sphi %s2348_s19, %s2598_s19   ;;  %s2259_s18 = sphi %s2346_s18, %s2600_s18   ;;  %s2255_s17 = sphi %s2344_s17, %s2599_s17  }
   0x7   : > { %s1620_s22 = sadd.s32 4294967294, %s2267_s20   ;;  %s2369_s23 = sadd.s32 1, %s2267_s20  }
   0x8   : > { %2579 = sst [smem:[#allocation17_spill]] %s2369_s23  ;;  %s270_s24 = sadd.s32 1, %s2263_s19 }
   0x9   : > { %s267_s25 = ssub.s32 %s2267_s20, %s2369_s23  ;;  %p280_p0 = scmp.ne.s32.totalorder %s2263_s19, %s2259_s18 }
   0xa   : > { %p268_p1 = scmp.eq.s32.totalorder %s267_s25, 0  ;;  %p281_p2 = scmp.eq.s32.totalorder %s2365_s21, 1 }
   0xb   : > { %p286_p3 = scmp.ne.s32.totalorder %s2259_s18, %s2255_s17  ;;  %p287_p4 = scmp.eq.s32.totalorder %s1620_s22, 1 }
   0xc   : > { %s2380_s26 = scalar_select %p268_p1, %s2263_s19, %s270_s24  }
   0xd   : > { %p2382_p5 = por %p281_p2, %p280_p0  ;;  %p2386_p6 = por %p287_p4, %p286_p3 }
   0xe   : > { %2580 = sst [smem:[#allocation18_spill]] %s2380_s26  ;;  %p1621_p7 = scmp.ge.s32.totalorder %s2267_s20, 1 }
   0xf   : > { %s2582_s28 = scalar_select %p2386_p6, 1, 0 }
  0x10   : > { %p294_p8 = scmp.lt.s32.totalorder %s2267_s20, 3  ;;  %p2577_p9 = scmp.eq.s32.totalorder %s2365_s21, 0 }
  0x11   : > { %2583 = sst [smem:[#allocation19_spill]] %s2582_s28  ;;  %s2269_s30 = smov [#allocation5]  }
  0x12   : > { %p2393_p10 = pnand %p1621_p7, %p294_p8  ;;  %s322_s12 = sshll.u32 %s2269_s30, 4  ;;  %s323_s12 = int_to_ptr.vmem [resolvable:$true] %s322_s12 }
  0x13   : > { %s2270_s14 = smov [#allocation8]   ;;  %s2076_s22 = scalar_lea.vmem %s323_s12, 8192 }
  0x14   : > { %p1850_p11 = pneg %p2393_p10  ;;  %s354_s15 = sshll.u32 %s2270_s14, 4  ;;  %s355_s15 = int_to_ptr.vmem [resolvable:$true] %s354_s15 }
  0x15   : > { %p2077_p0 = scmp.ne.s32.totalorder %s323_s12, %s2076_s22  ;;  %p2084_p3 = scmp.lt.s32.totalorder %s323_s12, %s323_s12 }
  0x16   : > { %p2401_p12 = pnand %p2577_p9, %p1850_p11  ;;  %p2085_p4 = scmp.lt.s32.totalorder %s2076_s22, %s2076_s22 }
  0x18   : > { %p2407_p13 = pneg %p2401_p12  ;;  %p2086_p7 = por %p2085_p4, %p2084_p3 }
  0x1a   : > { %p2079_p1 = pnand %p2077_p0, %p2407_p13 }
  0x1c   : > { %p2080_p2 = pneg %p2079_p1 }
  0x1e   : > { %p2087_p8 = pnand %p2086_p7, %p2080_p2 }
  0x20   : > { %2090 = shalt.err (!%p2087_p8)
}
  0x21   : > { %s2271_s24 = smov 128   ;;  %s2272_s25 = smov 8  }
  0x22   : > { %1856 = dma.hbm_to_vmem [thread:$0]  (!%p2401_p12), %s2560_s3, 8192, %s323_s12, [#allocation6], %s2271_s24, %s2271_s24, %s2272_s25  }
  0x23   : > { %s2273_s26 = smov [#allocation2]   ;;  %s2102_s23 = scalar_lea.vmem %s355_s15, 1024 }
  0x24   : > { %s306_s19 = sshll.u32 %s2273_s26, 4  ;;  %p2103_p11 = scmp.ne.s32.totalorder %s355_s15, %s2102_s23  ;;  %s307_s19 = int_to_ptr.vmem [resolvable:$true] %s306_s19 }
  0x25   : > { %p2110_p3 = scmp.lt.s32.totalorder %s355_s15, %s355_s15  ;;  %p2111_p2 = scmp.lt.s32.totalorder %s2102_s23, %s2102_s23 }
  0x26   : > { %p2105_p0 = pnand %p2103_p11, %p2407_p13 }
  0x27   : > { %p2112_p4 = por %p2111_p2, %p2110_p3 }
  0x28   : > { %p2106_p1 = pneg %p2105_p0 }
  0x2a   : > { %p2113_p7 = pnand %p2112_p4, %p2106_p1 }
  0x2c   : > { %2116 = shalt.err (!%p2113_p7)
}
  0x2d   : > { %s2573_s22 = smov 64   ;;  %s2575_s28 = smov 4  }
  0x2e   : > { %1862 = dma.hbm_to_vmem [thread:$0]  (!%p2401_p12), %s2564_s7, 1024, %s355_s15, [#allocation9], %s2573_s22, %s2573_s22, %s2575_s28  }
  0x2f   : > { %s2128_s24 = scalar_lea.vmem %s307_s19, 512  ;;  %p2136_p1 = scmp.lt.s32.totalorder %s307_s19, %s307_s19 }
  0x30   : > { %p2129_p8 = scmp.ne.s32.totalorder %s307_s19, %s2128_s24  ;;  %p2137_p3 = scmp.lt.s32.totalorder %s2128_s24, %s2128_s24 }
  0x32   : > { %p2131_p11 = pnand %p2129_p8, %p2407_p13  ;;  %p2138_p2 = por %p2137_p3, %p2136_p1 }
  0x34   : > { %p2132_p0 = pneg %p2131_p11 }
  0x36   : > { %p2139_p4 = pnand %p2138_p2, %p2132_p0 }
  0x38   : > { %2142 = shalt.err (!%p2139_p4)
}
  0x39   : > { %s2276_s23 = smov 256   ;;  %s2277_s25 = smov 16  }
  0x3a   : > { %1853 = dma.hbm_to_vmem [thread:$0]  (!%p2401_p12), %s2558_s1, 512, %s307_s19, [#allocation3], %s2276_s23, %s2276_s23, %s2277_s25  }
  0x3b   : > { %s2278_s15 = smov [#allocation7]   ;;  %s2279_s26 = smov [#allocation10]  }
  0x3c   : > { %s338_s12 = sshll.u32 %s2278_s15, 4  ;;  %s370_s22 = sshll.u32 %s2279_s26, 4  ;;  %s339_s12 = int_to_ptr.vmem [resolvable:$true] %s338_s12  ;;  %s371_s22 = int_to_ptr.vmem [resolvable:$true] %s370_s22 }
  0x3d   : > { %s2154_s28 = scalar_lea.vmem %s339_s12, 2048  ;;  %p2162_p0 = scmp.lt.s32.totalorder %s339_s12, %s339_s12 }
  0x3e   : > { %p2155_p7 = scmp.ne.s32.totalorder %s339_s12, %s2154_s28  ;;  %p2163_p1 = scmp.lt.s32.totalorder %s2154_s28, %s2154_s28 }
  0x40   : > { %p2157_p8 = pnand %p2155_p7, %p2407_p13  ;;  %p2164_p3 = por %p2163_p1, %p2162_p0 }
  0x42   : > { %p2158_p11 = pneg %p2157_p8 }
  0x44   : > { %p2165_p2 = pnand %p2164_p3, %p2158_p11 }
  0x46   : > { %2168 = shalt.err (!%p2165_p2)
}
  0x47   : > { %s2587_s24 = smov 4   ;;  %s2588_s30 = smov 64  }
  0x48   : > { %1859 = dma.hbm_to_vmem [thread:$0]  (!%p2401_p12), %s2562_s5, 2048, %s339_s12, [#allocation6], %s2588_s30, %s2588_s30, %s2587_s24  }
  0x49   : > { %s2180_s25 = scalar_lea.vmem %s371_s22, 1024  ;;  %p2188_p9 = scmp.lt.s32.totalorder %s371_s22, %s371_s22 }
  0x4a   : > { %p2181_p4 = scmp.ne.s32.totalorder %s371_s22, %s2180_s25  ;;  %p2189_p0 = scmp.lt.s32.totalorder %s2180_s25, %s2180_s25 }
  0x4c   : > { %p2183_p7 = pnand %p2181_p4, %p2407_p13  ;;  %p2190_p11 = por %p2189_p0, %p2188_p9 }
  0x4e   : > { %p2184_p8 = pneg %p2183_p7 }
  0x50   : > { %p2191_p1 = pnand %p2190_p11, %p2184_p8 }
  0x52   : > { %2194 = shalt.err (!%p2191_p1)
}
  0x53   : > { %1865 = dma.hbm_to_vmem [thread:$0]  (!%p2401_p12), %s2566_s9, 1024, %s371_s22, [#allocation9], %s2588_s30, %s2588_s30, %s2587_s24  }
  0x54   : > { %396 = sbr.rel (%p2393_p10) target bundleno = 1160 (0x488), region = 64  ;;  %p2589_p13 = scmp.eq.s32.totalorder (!%p2393_p10), %s2365_s21, 0 }
  0x59   : > { %2238 = dma.done.wait (%p2589_p13), [#allocation3], 512   ;;  %p2590_p3 = pmov %p2589_p13 }
  0x5b   : > { %2240 = vsyncadd (%p2590_p3), [#allocation3], 4294966784  ;;  %p2591_p9 = pmov %p2590_p3 }
  0x5c   : > { %p2592_p2 = pmov %p2590_p3 }
  0x5d   : > { %2242 = dma.done.wait (%p2591_p9), [#allocation6], 10240  }
  0x5e   : > { %2244 = vsyncadd (%p2592_p2), [#allocation6], 4294957056  ;;  %p2593_p4 = pmov %p2592_p2 }
  0x5f   : > { %p2594_p12 = pmov %p2592_p2 }
  0x60   : > { %2246 = dma.done.wait (%p2593_p4), [#allocation9], 2048  }
  0x61   : > { %2248 = vsyncadd (%p2594_p12), [#allocation9], 4294965248  ;;  %p451_p10 = scmp.lt.s32.totalorder %s2365_s21, 1  ;;  %v2280_v0 = vmov 0   ;;  %vm503_vm0 = vcmask 1044480   ;;  %vm499_vm1 = vcmask 80896  }
  0x62   : > { %548 = vmatprep.mubr.bf16.mxu1 %v2280_v0  ;;  %v1927_v1 = vld [vmem:[#allocation2 + $0x4] ss:$16 sps:$4 sm:$0x1f]   ;;  %v1929_v2 = vld [vmem:[#allocation2] ss:$16 sps:$4 sm:$0x1f]  }
  0x63   : > { %s452_s29 = scalar_select %p451_p10, %s2365_s21, 1  ;;  %1640 = vmatprep.subr.msk.bf16.mxu1 %vm503_vm0, %v1927_v1  ;;  %v1930_v4 = vld [vmem:[#allocation2 + $0xc] ss:$16 sps:$4 sm:$0x1f]   ;;  %v505_v5 = vsel %vm503_vm0, %v1929_v2, 0  ;;  %vm2282_vm2 = vmmov 0  }
  0x64   : > { %v1932_v6 = vld [vmem:[#allocation2 + $0x8] ss:$16 sps:$4 sm:$0x1f]   ;;  %531 = vmatpush1.bf16.msra.mxu1 %v505_v5  ;;  %v1933_v7 = vld [vmem:[#allocation5 + $0x74] ss:$8 sps:$4 sm:$0xff]   ;;  %s1745_s22 = sshll.u32 %s2365_s21, 7 }
  0x65   : > { %s1635_s13 = sshll.u32 %s452_s29, 2  ;;  %v1935_v8 = vld [vmem:[#allocation5 + $0x70] ss:$8 sps:$4 sm:$0xff]   ;;  %1642 = vmatprep.subr.msk.bf16.mxu1 %vm503_vm0, %v1930_v4  ;;  %v511_v9 = vsel %vm503_vm0, %v1932_v6, 0  ;;  %v1936_v10 = vld [vmem:[#allocation5 + $0x64] ss:$8 sps:$4 sm:$0xff]   ;;  %1002 = vmatprep.subr.bf16.mxu0 %v1933_v7  ;;  %s1509_s30 = scalar_lea.hbm %s2568_s11, %s1745_s22 }
  0x66   : > { %s454_s15 = scalar_lea.vmem %s2557_s0, %s1635_s13  ;;  %1003 = vmatpush1.bf16.msra.mxu0 %v1935_v8  ;;  %v1938_v11 = vld [vmem:[#allocation5 + $0x60] ss:$8 sps:$4 sm:$0xff]   ;;  %v1943_v12 = vld [vmem:[#allocation5 + $0x174] ss:$8 sps:$4 sm:$0xff]   ;;  %v1941_v14 = vld [vmem:[#allocation5 + $0x170] ss:$8 sps:$4 sm:$0xff]  }
  0x67   : > { %v456_v3 = vld [vmem:[%s454_s15] sm:$0xf]  ;;  %v1939_v13 = vld [vmem:[#allocation5 + $0x54] ss:$8 sps:$4 sm:$0xff]   ;;  %1004 = vmatprep.subr.bf16.mxu0 %v1936_v10  ;;  %v1944_v15 = vld [vmem:[#allocation5 + $0x50] ss:$8 sps:$4 sm:$0xff]  }
  0x68   : > { %1641 = vmatmul.mubr.msk.bf16.vlgmr.msra.gmra.mxu1 %vm499_vm1, %v456_v3  ;;  %v1945_v16 = vld [vmem:[#allocation5 + $0x44] ss:$8 sps:$4 sm:$0xff]   ;;  %v1947_v18 = vld [vmem:[#allocation5 + $0x160] ss:$8 sps:$4 sm:$0xff]   ;;  %v1951_v20 = vld [vmem:[#allocation5 + $0x34] ss:$8 sps:$4 sm:$0xff]  }
  0x69   : > { %572 = vmatpush1.bf16.msra.mxu1 %v511_v9  ;;  %589 = vmatprep.mubr.bf16.mxu1 %v2280_v0  ;;  %v1949_v17 = vld [vmem:[#allocation5 + $0x164] ss:$8 sps:$4 sm:$0xff]   ;;  %v1950_v19 = vld [vmem:[#allocation5 + $0x40] ss:$8 sps:$4 sm:$0xff]   ;;  %v1955_v21 = vld [vmem:[#allocation5 + $0x154] ss:$8 sps:$4 sm:$0xff]   ;;  %v463_v9 = vlaneseq }
  0x6a   : > { %1043 = vmatprep.subr.bf16.mxu1 %v1943_v12  ;;  %1005 = vmatpush1.bf16.msra.mxu0 %v1938_v11  ;;  %v1953_v22 = vld [vmem:[#allocation5 + $0x150] ss:$8 sps:$4 sm:$0xff]   ;;  %v1957_v24 = vld [vmem:[#allocation5 + $0x24] ss:$8 sps:$4 sm:$0xff]   ;;  %v1959_v26 = vld [vmem:[#allocation5 + $0x140] ss:$8 sps:$4 sm:$0xff]  }
  0x6b   : > { %1006 = vmatprep.subr.bf16.mxu0 %v1939_v13  ;;  %v1956_v23 = vld [vmem:[#allocation5 + $0x30] ss:$8 sps:$4 sm:$0xff]   ;;  %v1961_v25 = vld [vmem:[#allocation5 + $0x144] ss:$8 sps:$4 sm:$0xff]   ;;  %v1962_v27 = vld [vmem:[#allocation5 + $0x20] ss:$8 sps:$4 sm:$0xff]  }
  0x6c   : > { %v1963_v28 = vld [vmem:[#allocation5 + $0x14] ss:$8 sps:$4 sm:$0xff]   ;;  %v1965_v30 = vld [vmem:[#allocation5 + $0x130] ss:$8 sps:$4 sm:$0xff]   ;;  %v1969_v32 = vld [vmem:[#allocation5 + $0x4] ss:$8 sps:$4 sm:$0xff]  }
  0x6d   : > { %v1967_v29 = vld [vmem:[#allocation5 + $0x134] ss:$8 sps:$4 sm:$0xff]   ;;  %v1968_v31 = vld [vmem:[#allocation5 + $0x10] ss:$8 sps:$4 sm:$0xff]   ;;  %v1973_v33 = vld [vmem:[#allocation5 + $0x124] ss:$8 sps:$4 sm:$0xff]  }
  0x6e   : > { %1007 = vmatpush1.bf16.msra.mxu0 %v1944_v15  ;;  %v1971_v34 = vld [vmem:[#allocation5 + $0x120] ss:$8 sps:$4 sm:$0xff]   ;;  %v1975_v36 = vld [vmem:[#allocation5 + $0xf4] ss:$8 sps:$4 sm:$0xff]   ;;  %v1977_v38 = vld [vmem:[#allocation5 + $0x110] ss:$8 sps:$4 sm:$0xff]  }
  0x6f   : > { %1008 = vmatprep.subr.bf16.mxu0 %v1945_v16  ;;  %v1974_v35 = vld [vmem:[#allocation5] ss:$8 sps:$4 sm:$0xff]   ;;  %v1979_v37 = vld [vmem:[#allocation5 + $0x114] ss:$8 sps:$4 sm:$0xff]   ;;  %v1980_v39 = vld [vmem:[#allocation5 + $0xf0] ss:$8 sps:$4 sm:$0xff]  }
  0x70   : > { %1643 = vmatmul.mubr.msk.bf16.vlgmr.msra.gmra.mxu1 %vm499_vm1, %v456_v3  ;;  %v1981_v40 = vld [vmem:[#allocation5 + $0xe4] ss:$8 sps:$4 sm:$0xff]   ;;  %v1986_v42 = vld [vmem:[#allocation5 + $0xe0] ss:$8 sps:$4 sm:$0xff]   ;;  %v1987_v44 = vld [vmem:[#allocation5 + $0xd4] ss:$8 sps:$4 sm:$0xff]  }
  0x71   : > { %1044 = vmatpush1.bf16.msra.mxu1 %v1941_v14  ;;  %v1985_v41 = vld [vmem:[#allocation5 + $0x104] ss:$8 sps:$4 sm:$0xff]   ;;  %v1983_v43 = vld [vmem:[#allocation5 + $0x100] ss:$8 sps:$4 sm:$0xff]   ;;  %v1991_v45 = vld [vmem:[#allocation5 + $0x1f4] ss:$8 sps:$4 sm:$0xff]  }
  0x72   : > { %1045 = vmatprep.subr.bf16.mxu1 %v1949_v17  ;;  %1009 = vmatpush1.bf16.msra.mxu0 %v1950_v19  ;;  %v1992_v46 = vld [vmem:[#allocation5 + $0xd0] ss:$8 sps:$4 sm:$0xff]   ;;  %v1993_v48 = vld [vmem:[#allocation5 + $0xc4] ss:$8 sps:$4 sm:$0xff]   ;;  %v1998_v50 = vld [vmem:[#allocation5 + $0xc0] ss:$8 sps:$4 sm:$0xff]  }
  0x73   : > { %1010 = vmatprep.subr.bf16.mxu0 %v1951_v20  ;;  %v1989_v47 = vld [vmem:[#allocation5 + $0x1f0] ss:$8 sps:$4 sm:$0xff]   ;;  %v1997_v49 = vld [vmem:[#allocation5 + $0x1e4] ss:$8 sps:$4 sm:$0xff]   ;;  %v1995_v51 = vld [vmem:[#allocation5 + $0x1e0] ss:$8 sps:$4 sm:$0xff]  }
  0x74   : > { %v1999_v52 = vld [vmem:[#allocation5 + $0xb4] ss:$8 sps:$4 sm:$0xff]   ;;  %v2004_v54 = vld [vmem:[#allocation5 + $0xb0] ss:$8 sps:$4 sm:$0xff]   ;;  %v2005_v56 = vld [vmem:[#allocation5 + $0xa4] ss:$8 sps:$4 sm:$0xff]  }
  0x75   : > { %1046 = vmatpush1.bf16.msra.mxu1 %v1947_v18  ;;  %v2003_v53 = vld [vmem:[#allocation5 + $0x1d4] ss:$8 sps:$4 sm:$0xff]   ;;  %v2001_v55 = vld [vmem:[#allocation5 + $0x1d0] ss:$8 sps:$4 sm:$0xff]   ;;  %v2009_v57 = vld [vmem:[#allocation5 + $0x1c4] ss:$8 sps:$4 sm:$0xff]  }
  0x76   : > { %1047 = vmatprep.subr.bf16.mxu1 %v1955_v21  ;;  %1011 = vmatpush1.bf16.msra.mxu0 %v1956_v23  ;;  %v2010_v58 = vld [vmem:[#allocation5 + $0xa0] ss:$8 sps:$4 sm:$0xff]   ;;  %v2011_v60 = vld [vmem:[#allocation5 + $0x94] ss:$8 sps:$4 sm:$0xff]   ;;  %v2013_v62 = vld [vmem:[#allocation5 + $0x1b0] ss:$8 sps:$4 sm:$0xff]  }
  0x77   : > { %1012 = vmatprep.subr.bf16.mxu0 %v1957_v24  ;;  %v2007_v59 = vld [vmem:[#allocation5 + $0x1c0] ss:$8 sps:$4 sm:$0xff]   ;;  %v2015_v61 = vld [vmem:[#allocation5 + $0x1b4] ss:$8 sps:$4 sm:$0xff]   ;;  %v2016_v63 = vld [vmem:[#allocation5 + $0x90] ss:$8 sps:$4 sm:$0xff]  }
  0x78   : > { %v2017_v0 = vld [vmem:[#allocation5 + $0x84] ss:$8 sps:$4 sm:$0xff]   ;;  %v2019_v2 = vld [vmem:[#allocation5 + $0x1a0] ss:$8 sps:$4 sm:$0xff]   ;;  %v2025_v4 = vld [vmem:[#allocation5 + $0x194] ss:$8 sps:$4 sm:$0xff]  }
  0x79   : > { %1048 = vmatpush1.bf16.msra.mxu1 %v1953_v22  ;;  %v2021_v1 = vld [vmem:[#allocation5 + $0x1a4] ss:$8 sps:$4 sm:$0xff]   ;;  %v2022_v3 = vld [vmem:[#allocation5 + $0x80] ss:$8 sps:$4 sm:$0xff]   ;;  %v2023_v5 = vld [vmem:[#allocation5 + $0x190] ss:$8 sps:$4 sm:$0xff]  }
  0x7a   : > { %1049 = vmatprep.subr.bf16.mxu1 %v1961_v25  ;;  %1013 = vmatpush1.bf16.msra.mxu0 %v1962_v27  ;;  %v2028_v6 = vld [vmem:[#allocation5 + $0x184] ss:$8 sps:$4 sm:$0xff]   ;;  %v2026_v7 = vld [vmem:[#allocation5 + $0x180] ss:$8 sps:$4 sm:$0xff]   ;;  %v2029_v8 = vld [vmem:[#allocation7 + $0x78] sm:$0xff]   ;;  %v2476_v10 = vshrl.u32 %v463_v9, 7 }
  0x7b   : > { %1014 = vmatprep.subr.bf16.mxu0 %v1963_v28  ;;  %v461_v12 = vld [vmem:[%s2559_s2] sm:$0xf]  ;;  %s448_s13 = sand.u32 1, %s2259_s18   ;;  %s2283_s25 = smov [#allocation11]  }
  0x7c   : > { %v465_v11 = vsub.s32 0, %v2476_v10  ;;  %v469_v13 = vsub.s32 1, %v2476_v10  ;;  %v473_v18 = vsub.s32 2, %v2476_v10  ;;  %v477_v21 = vsub.s32 3, %v2476_v10  ;;  %v2051_v10 = vld [vmem:[#allocation8 + $0x8] sm:$0xff]   ;;  %s1634_s16 = sshll.u32 %s448_s13, 3 }
  0x7d   : > { %1050 = vmatpush1.bf16.msra.mxu1 %v1959_v26  ;;  %s450_s15 = scalar_lea.vmem [#allocation11], %s1634_s16  ;;  %s1498_s19 = scalar_lea.sflag [#allocation4], %s448_s13 }
  0x7e   : > { %1051 = vmatprep.subr.bf16.mxu1 %v1967_v29  ;;  %1015 = vmatpush1.bf16.msra.mxu0 %v1968_v31  ;;  %v466_v14 = vrot.slane %v461_v12, %v465_v11  ;;  %v470_v15 = vrot.slane %v461_v12, %v469_v13  ;;  %v474_v24 = vrot.slane %v461_v12, %v473_v18  ;;  %v2030_v29 = vld [vmem:[#allocation7 + $0x38] sm:$0xff]   ;;  %s1511_s12 = sshll.u32 %s450_s15, 4  ;;  %s2199_s28 = sshll.u32 %s2283_s25, 4  ;;  %s1512_s12 = int_to_ptr.vmem [resolvable:$true] %s1511_s12  ;;  %s2200_s28 = int_to_ptr.vmem [resolvable:$false] %s2199_s28 }
  0x7f   : > { %1016 = vmatprep.subr.bf16.mxu0 %v1969_v32  ;;  %v478_v28 = vrot.slane %v461_v12, %v477_v21  ;;  %v2031_v32 = vld [vmem:[#allocation7 + $0x70] sm:$0xff]   ;;  %v2055_v21 = vld [vmem:[#allocation10 + $0x28] sm:$0xff]   ;;  %s2195_s23 = scalar_lea.vmem %s1512_s12, 128  ;;  %s2201_s21 = scalar_lea.vmem %s2200_s28, 256 }
  0x80   : > { %p2196_p7 = scmp.ne.s32.totalorder %s1512_s12, %s2195_s23  ;;  %p2202_p11 = scmp.lt.s32.totalorder %s1512_s12, %s2200_s28 }
  0x81   : > { %1052 = vmatpush1.bf16.msra.mxu1 %v1965_v30  ;;  %p2203_p1 = scmp.lt.s32.totalorder %s2201_s21, %s2195_s23 }
  0x82   : > { %1053 = vmatprep.subr.bf16.mxu1 %v1973_v33  ;;  %1017 = vmatpush1.bf16.msra.mxu0 %v1974_v35  ;;  %p2197_p8 = pnand %p2196_p7, %p2382_p5 }
  0x83   : > { %1018 = vmatprep.subr.bf16.mxu0 %v1975_v36  ;;  %v2032_v36 = vld [vmem:[#allocation7 + $0x30] sm:$0xff]   ;;  %p2204_p13 = por %p2203_p1, %p2202_p11 }
  0x84   : > { %p2198_p0 = pneg %p2197_p8 }
  0x85   : > { %1054 = vmatpush1.bf16.msra.mxu1 %v1971_v34 }
  0x86   : > { %1055 = vmatprep.subr.bf16.mxu1 %v1979_v37  ;;  %1019 = vmatpush2.bf16.msra.mxu0 %v1980_v39  ;;  %v2033_v39 = vld [vmem:[#allocation7 + $0x68] sm:$0xff]   ;;  %p2205_p3 = pnand %p2204_p13, %p2198_p0 }
  0x87   : > { %1020 = vmatprep.subr.bf16.mxu0 %v1981_v40 }
  0x89   : > { %1056 = vmatpush1.bf16.msra.mxu1 %v1977_v38 }
  0x8a   : > { %1057 = vmatprep.subr.bf16.mxu1 %v1985_v41  ;;  %1021 = vmatpush2.bf16.msra.mxu0 %v1986_v42 }
  0x8b   : > { %1022 = vmatprep.subr.bf16.mxu0 %v1987_v44 }
  0x8d   : > { %1058 = vmatpush1.bf16.msra.mxu1 %v1983_v43  ;;  %v2034_v43 = vld [vmem:[#allocation7 + $0x28] sm:$0xff]  }
  0x8e   : > { %1059 = vmatprep.subr.bf16.mxu1 %v1991_v45  ;;  %1023 = vmatpush2.bf16.msra.mxu0 %v1992_v46  ;;  %v2035_v45 = vld [vmem:[#allocation7 + $0x60] sm:$0xff]  }
  0x8f   : > { %1024 = vmatprep.subr.bf16.mxu0 %v1993_v48  ;;  %v2036_v46 = vld [vmem:[#allocation7 + $0x20] sm:$0xff]   ;;  %v2038_v48 = vld [vmem:[#allocation7 + $0x18] sm:$0xff]  }
  0x91   : > { %1060 = vmatpush2.bf16.msra.mxu1 %v1989_v47  ;;  %v2037_v47 = vld [vmem:[#allocation7 + $0x58] sm:$0xff]  }
  0x92   : > { %1061 = vmatprep.subr.bf16.mxu1 %v1997_v49  ;;  %1025 = vmatpush2.bf16.msra.mxu0 %v1998_v50  ;;  %v2039_v49 = vld [vmem:[#allocation7 + $0x50] sm:$0xff]  }
  0x93   : > { %1026 = vmatprep.subr.bf16.mxu0 %v1999_v52  ;;  %v2040_v50 = vld [vmem:[#allocation7 + $0x10] sm:$0xff]   ;;  %v2042_v52 = vld [vmem:[#allocation7 + $0x8] sm:$0xff]  }
  0x95   : > { %1062 = vmatpush2.bf16.msra.mxu1 %v1995_v51  ;;  %v2041_v51 = vld [vmem:[#allocation7 + $0x48] sm:$0xff]  }
  0x96   : > { %1063 = vmatprep.subr.bf16.mxu1 %v2003_v53  ;;  %1027 = vmatpush2.bf16.msra.mxu0 %v2004_v54  ;;  %v2043_v53 = vld [vmem:[#allocation7 + $0x40] sm:$0xff]  }
  0x97   : > { %1028 = vmatprep.subr.bf16.mxu0 %v2005_v56  ;;  %v2044_v54 = vld [vmem:[#allocation7] sm:$0xff]   ;;  %v2281_v56 = vmov 0.0  }
  0x99   : > { %1064 = vmatpush2.bf16.msra.mxu1 %v2001_v55  ;;  %v2045_v55 = vld [vmem:[#allocation8 + $0x38] sm:$0xff]  }
  0x9a   : > { %1065 = vmatprep.subr.bf16.mxu1 %v2009_v57  ;;  %1029 = vmatpush2.bf16.msra.mxu0 %v2010_v58  ;;  %v2046_v57 = vld [vmem:[#allocation8 + $0x30] sm:$0xff]   ;;  %v2047_v58 = vld [vmem:[#allocation8 + $0x28] sm:$0xff]  }
  0x9b   : > { %1030 = vmatprep.subr.bf16.mxu0 %v2011_v60  ;;  %v2049_v60 = vld [vmem:[#allocation8 + $0x18] sm:$0xff]  }
  0x9d   : > { %1066 = vmatpush2.bf16.msra.mxu1 %v2007_v59  ;;  %v2048_v59 = vld [vmem:[#allocation8 + $0x20] sm:$0xff]  }
  0x9e   : > { %1067 = vmatprep.subr.bf16.mxu1 %v2015_v61  ;;  %1031 = vmatpush2.bf16.msra.mxu0 %v2016_v63  ;;  %v670_v61 = vld [vmem:[%s2561_s4] sm:$0x3] }
  0x9f   : > { %1032 = vmatprep.subr.bf16.mxu0 %v2017_v0  ;;  %v675_v0 = vrot.slane %v670_v61, %v465_v11  ;;  %v2050_v11 = vld [vmem:[#allocation8 + $0x10] sm:$0xff]  }
  0xa1   : > { %1068 = vmatpush2.bf16.msra.mxu1 %v2013_v62 }
  0xa2   : > { %1069 = vmatprep.subr.bf16.mxu1 %v2021_v1  ;;  %1033 = vmatpush2.bf16.msra.mxu0 %v2022_v3 }
  0xa3   : > { %1748 = vmatprep.subr.bf16.mxu0 %v2029_v8 }
  0xa5   : > { %1070 = vmatpush2.bf16.msra.mxu1 %v2019_v2  ;;  %v679_v2 = vrot.slane %v670_v61, %v469_v13  ;;  %v2052_v13 = vld [vmem:[#allocation8] sm:$0xff]  }
  0xa6   : > { %1071 = vmatprep.subr.bf16.mxu1 %v2025_v4 }
  0xa9   : > { %1072 = vmatpush2.bf16.msra.mxu1 %v2023_v5 }
  0xaa   : > { %1073 = vmatprep.subr.bf16.mxu1 %v2028_v6 }
  0xad   : > { %1074 = vmatpush2.bf16.msra.mxu1 %v2026_v7 }
  0xae   : > { %1788 = vmatprep.subr.bf16.mxu1 %v2281_v56 }
 0x128   : > { %v550_v16 = vpop.f32.mrf.mxu1 }
 0x129   : > { %v551_v17 = vadd.f32 %v550_v16, %v466_v14 }
 0x12a   : > { %v552_v19 = vpop.f32.mrf.mxu1 }
 0x12b   : > { %v553_v20 = vadd.f32 %v552_v19, %v470_v15  ;;  %v598_v22 = vmax.f32 %v551_v17, 0.0  ;;  %v2053_v19 = vld [vmem:[#allocation10 + $0x38] sm:$0xff]  }
 0x12c   : > { %v554_v23 = vpop.f32.mrf.mxu1 }
 0x12d   : > { %v599_v25 = vmax.f32 %v553_v20, 0.0  ;;  %v602_v30 = vpack.c.bf16 %v598_v22, %v598_v22  ;;  %v2054_v20 = vld [vmem:[#allocation10 + $0x30] sm:$0xff]   ;;  %v2056_v22 = vld [vmem:[#allocation10 + $0x20] sm:$0xff]   ;;  %v2057_v23 = vld [vmem:[#allocation10 + $0x18] sm:$0xff]  }
 0x12e   : > { %v555_v26 = vpop.f32.mrf.mxu1 }
 0x12f   : > { %v603_v27 = vpack.c.bf16 %v599_v25, %v599_v25  ;;  %v1708_v26 = vld [vmem:[%s2563_s6] ss:$0 sm:$0xff] }
 0x130   : > { %v591_v31 = vpop.f32.mrf.mxu1 }
 0x131   : > { %v592_v33 = vadd.f32 %v591_v31, %v474_v24  ;;  %1034 = vmatprep.mubr.bf16.mxu0 %v603_v27  ;;  %v2058_v24 = vld [vmem:[#allocation10 + $0x10] sm:$0xff]  }
 0x132   : > { %v593_v34 = vpop.f32.mrf.mxu1  ;;  %1035 = vmatmul.mubr.bf16.vlgmr.msra.gmra.mxu0 %v602_v30 }
 0x133   : > { %v594_v35 = vadd.f32 %v593_v34, %v478_v28  ;;  %1749 = vmatpush3.bf16.msra.mxu0 %v2030_v29  ;;  %v600_v37 = vmax.f32 %v592_v33, 0.0  ;;  %v2059_v34 = vld [vmem:[#allocation10 + $0x8] sm:$0xff]  }
 0x134   : > { %v595_v38 = vpop.f32.mrf.mxu1  ;;  %1750 = vmatprep.subr.bf16.mxu0 %v2031_v32 }
 0x135   : > { %v601_v40 = vmax.f32 %v594_v35, 0.0  ;;  %v604_v44 = vpack.c.bf16 %v600_v37, %v600_v37  ;;  %v2060_v35 = vld [vmem:[#allocation10] sm:$0xff]  }
 0x136   : > { %v596_v41 = vpop.f32.mrf.mxu1 }
 0x137   : > { %v605_v42 = vpack.c.bf16 %v601_v40, %v601_v40  ;;  %1751 = vmatpush3.bf16.msra.mxu0 %v2032_v36  ;;  %v1725_v36 = vld [vmem:[%s2565_s8] ss:$0 sm:$0xff] }
 0x138   : > { %1752 = vmatprep.subr.bf16.mxu0 %v2033_v39 }
 0x139   : > { %1075 = vmatprep.mubr.bf16.mxu1 %v605_v42 }
 0x13a   : > { %1076 = vmatmul.mubr.bf16.vlgmr.msra.gmra.mxu1 %v604_v44  ;;  %v1734_v44 = vld [vmem:[%s2567_s10] ss:$0 sm:$0xff] }
 0x13b   : > { %1753 = vmatpush3.bf16.msra.mxu0 %v2034_v43  ;;  %1789 = vmatpush3.bf16.msra.mxu1 %v2045_v55 }
 0x13c   : > { %1754 = vmatprep.subr.bf16.mxu0 %v2035_v45  ;;  %1790 = vmatprep.subr.bf16.mxu1 %v2281_v56 }
 0x13d   : > { %1804 = vmatprep.mubr.msk.bf16.mxu1 %vm2282_vm2, %v2281_v56 }
 0x13f   : > { %1755 = vmatpush3.bf16.msra.mxu0 %v2036_v46  ;;  %1791 = vmatpush3.bf16.msra.mxu1 %v2046_v57 }
 0x140   : > { %1756 = vmatprep.subr.bf16.mxu0 %v2037_v47  ;;  %1792 = vmatprep.subr.bf16.mxu1 %v2281_v56 }
 0x143   : > { %1757 = vmatpush3.bf16.msra.mxu0 %v2038_v48  ;;  %1793 = vmatpush3.bf16.msra.mxu1 %v2047_v58 }
 0x144   : > { %1758 = vmatprep.subr.bf16.mxu0 %v2039_v49  ;;  %1794 = vmatprep.subr.bf16.mxu1 %v2281_v56 }
 0x147   : > { %1759 = vmatpush3.bf16.msra.mxu0 %v2040_v50  ;;  %1795 = vmatpush3.bf16.msra.mxu1 %v2048_v59 }
 0x148   : > { %1760 = vmatprep.subr.bf16.mxu0 %v2041_v51  ;;  %1796 = vmatprep.subr.bf16.mxu1 %v2281_v56 }
 0x14b   : > { %1761 = vmatpush3.bf16.msra.mxu0 %v2042_v52  ;;  %1797 = vmatpush3.bf16.msra.mxu1 %v2049_v60 }
 0x14c   : > { %1762 = vmatprep.subr.bf16.mxu0 %v2043_v53  ;;  %1798 = vmatprep.subr.bf16.mxu1 %v2281_v56 }
 0x14f   : > { %1763 = vmatpush3.bf16.msra.mxu0 %v2044_v54  ;;  %1799 = vmatpush3.bf16.msra.mxu1 %v2050_v11 }
 0x150   : > { %1808 = vmatprep.subr.bf16.mxu0 %v2281_v56  ;;  %1800 = vmatprep.subr.bf16.mxu1 %v2281_v56 }
 0x153   : > { %1801 = vmatpush3.bf16.msra.mxu1 %v2051_v10 }
 0x154   : > { %1802 = vmatprep.subr.bf16.mxu1 %v2281_v56 }
 0x157   : > { %1803 = vmatpush3.bf16.msra.mxu1 %v2052_v13 }
 0x1f2   : > { %v1036_v62 = vpop.f32.mrf.mxu0 }
 0x1f3   : > { %v1037_v4 = vadd.f32 %v1036_v62, %v675_v0 }
 0x1f4   : > { %v1038_v63 = vpop.f32.mrf.mxu0 }
 0x1f5   : > { %v1039_v6 = vadd.f32 %v1038_v63, %v679_v2 }
 0x1f6   : > { %v1040_v1 = vpop.f32.mrf.mxu0 }
 0x1f8   : > { %v1041_v3 = vpop.f32.mrf.mxu0 }
 0x1fa   : > { %v1077_v5 = vpop.f32.mrf.mxu1 }
 0x1fb   : > { %v1078_v7 = vadd.f32 %v1077_v5, %v1037_v4 }
 0x1fc   : > { %v1079_v8 = vpop.f32.mrf.mxu1 }
 0x1fd   : > { %v1080_v9 = vadd.f32 %v1079_v8, %v1039_v6  ;;  %v1084_v12 = vmax.f32 %v1078_v7, 0.0 }
 0x1fe   : > { %v1081_v14 = vpop.f32.mrf.mxu1 }
 0x1ff   : > { %v1085_v15 = vmax.f32 %v1080_v9, 0.0  ;;  %v1086_v18 = vpack.c.bf16 %v1084_v12, %v1084_v12 }
 0x200   : > { %v1082_v16 = vpop.f32.mrf.mxu1 }
 0x201   : > { %v1087_v17 = vpack.c.bf16 %v1085_v15, %v1085_v15 }
 0x203   : > { %1255 = vmatprep.mubr.bf16.mxu0 %v1087_v17 }
 0x204   : > { %1256 = vmatmul.mubr.bf16.vlgmr.msra.gmra.mxu0 %v1086_v18 }
 0x205   : > { %1824 = vmatprep.mubr.msk.bf16.mxu0 %vm2282_vm2, %v2281_v56  ;;  %1809 = vmatpush3.bf16.msra.mxu0 %v2053_v19 }
 0x206   : > { %1810 = vmatprep.subr.bf16.mxu0 %v2281_v56 }
 0x209   : > { %1811 = vmatpush3.bf16.msra.mxu0 %v2054_v20 }
 0x20a   : > { %1812 = vmatprep.subr.bf16.mxu0 %v2281_v56 }
 0x20d   : > { %1813 = vmatpush3.bf16.msra.mxu0 %v2055_v21 }
 0x20e   : > { %1814 = vmatprep.subr.bf16.mxu0 %v2281_v56 }
 0x211   : > { %1815 = vmatpush3.bf16.msra.mxu0 %v2056_v22 }
 0x212   : > { %1816 = vmatprep.subr.bf16.mxu0 %v2281_v56 }
 0x215   : > { %1817 = vmatpush3.bf16.msra.mxu0 %v2057_v23 }
 0x216   : > { %1818 = vmatprep.subr.bf16.mxu0 %v2281_v56 }
 0x219   : > { %1819 = vmatpush3.bf16.msra.mxu0 %v2058_v24 }
 0x21a   : > { %1820 = vmatprep.subr.bf16.mxu0 %v2281_v56 }
 0x21d   : > { %1821 = vmatpush3.bf16.msra.mxu0 %v2059_v34 }
 0x21e   : > { %1822 = vmatprep.subr.bf16.mxu0 %v2281_v56 }
 0x221   : > { %1823 = vmatpush3.bf16.msra.mxu0 %v2060_v35 }
 0x2c4   : > { %v1764_v25 = vpop.f32.mrf.mxu0 }
 0x2c6   : > { %v1765_v27 = vpop.f32.mrf.mxu0 }
 0x2c7   : > { %v1766_v28 = vadd.f32 %v1765_v27, %v1764_v25 }
 0x2c8   : > { %v1767_v29 = vpop.f32.mrf.mxu0 }
 0x2c9   : > { %v1258_v30 = vadd.f32 %v1766_v28, %v1708_v26 }
 0x2ca   : > { %v1768_v31 = vpop.f32.mrf.mxu0 }
 0x2cb   : > { %v1263_v32 = vmax.f32 %v1258_v30, 0.0 }
 0x2cd   : > { %v1264_v33 = vpack.c.bf16 %v1263_v32, %v1263_v32 }
 0x2cf   : > { %1805 = vmatmul.mubr.bf16.vlgmr.msra.gmra.mxu1 %v1264_v33 }
 0x38f   : > { %v1370_v37 = vpop.f32.mrf.mxu1 }
 0x390   : > { %v1371_v38 = vadd.f32 %v1725_v36, %v1370_v37 }
 0x391   : > { %v1806_v39 = vpop.f32.mrf.mxu1 }
 0x392   : > { %v1376_v40 = vmax.f32 %v1371_v38, 0.0 }
 0x393   : > { %v1373_v41 = vpop.f32.mrf.mxu1 }
 0x394   : > { %v1377_v42 = vpack.c.bf16 %v1376_v40, %v1376_v40 }
 0x395   : > { %v1807_v43 = vpop.f32.mrf.mxu1 }
 0x396   : > { %1825 = vmatmul.mubr.bf16.vlgmr.msra.gmra.mxu0 %v1377_v42 }
 0x456   : > { %v1483_v45 = vpop.f32.mrf.mxu0 }
 0x457   : > { %v1484_v46 = vadd.f32 %v1734_v44, %v1483_v45 }
 0x458   : > { %v1826_v47 = vpop.f32.mrf.mxu0 }
 0x459   : > { %v1743_v48 = vmul.f32 -1.442695, %v1484_v46 }
 0x45a   : > { %v1486_v49 = vpop.f32.mrf.mxu0 }
 0x45b   : > { %2061 = vpow2.f32 %v1743_v48 }
 0x45c   : > { %v1827_v50 = vpop.f32.mrf.mxu0 }
 0x468   : > { %v2062_v51 = vpop.eup %2061 }
 0x469   : > { %v1492_v52 = vadd.f32 1.0, %v2062_v51 }
 0x46b   : > { %2063 = vrcp.f32 %v1492_v52 }
 0x478   : > { %v2064_v53 = vpop.eup %2063 }
 0x479   : > { %v1495_v54 = vmul.f32 5.0, %v2064_v53 }
 0x47b   : > { %1496 = vst [vmem:[%s450_s15] sm:$0xff] %v1495_v54 }
 0x47c   : > { %2208 = shalt.err (!%p2205_p3)
}
 0x47d   : > { %s2209_s14 = scalar_lea.hbm %s1509_s30, 128  ;;  %s2213_s16 = scalar_lea.hbm %s2568_s11, 256 }
 0x47e   : > { %p2210_p9 = scmp.ne.s32.totalorder %s1509_s30, %s2209_s14  ;;  %p2214_p12 = scmp.lt.s32.totalorder %s1509_s30, %s2568_s11 }
 0x47f   : > { %p2215_p10 = scmp.lt.s32.totalorder %s2213_s16, %s2209_s14 }
 0x480   : > { %p2211_p2 = pnand %p2210_p9, %p2382_p5 }
 0x481   : > { %p2216_p7 = por %p2215_p10, %p2214_p12 }
 0x482   : > { %p2212_p4 = pneg %p2211_p2 }
 0x484   : > { %p2217_p8 = pnand %p2216_p7, %p2212_p4 }
 0x486   : > { %2220 = shalt.err (!%p2217_p8)
}
 0x487   : > { %1848 = dma.vmem_to_hbm [thread:$0]  (%p2382_p5), %s1512_s12, 128, %s1509_s30, %s1498_s19  }
 0x488 PF: > { %p1880_p0 = scmp.ge.s32.totalorder %s2267_s20, 2  ;;  %s1523_s24 = sand.u32 1, %s2255_s17  }
 0x489   : > { %s1524_s23 = scalar_lea.sflag [#allocation4], %s1523_s24 }
 0x48a   : > { %p1867_p11 = pnand %p1880_p0, %p2386_p6 }
 0x48c   : > { %p1868_p1 = pneg %p1867_p11 }
 0x48e   : > { %2250 = dma.done.wait (%p1868_p1), %s1524_s23, 128  }
 0x48f   : > { %2252 = vsyncadd (%p1868_p1), %s1524_s23, 4294967168  ;;  %s2596_s20 = sld [smem:[#allocation17_spill]]  ;;  %s2599_s17 = smov %s2259_s18 }
 0x490   : > { %s2597_s25 = sld [smem:[#allocation16_spill]] }
 0x491   : > { %s2598_s19 = sld [smem:[#allocation18_spill]] }
 0x495   : > { %p24_p13 = scmp.ge.s32.totalorder %s2596_s20, 4  }
 0x496   : > { %s2600_s18 = smov %s2597_s25 }
 0x497   :  { %26 = sbr.rel (!%p24_p13) target bundleno = 6 (0x6), region = 120 }
 0x49c   :  { %1529 = vsyncpa [#allocation3], 1 }
 0x49d   :  { %1531 = vsyncpa [#allocation3 + $0x1], 1 }
 0x49e   :  { %1532 = vsyncpa [#allocation6], 1 }
 0x49f   :  { %1533 = vsyncpa [#allocation9], 1 }
 0x4a0   :  { %1534 = vsyncpa [#allocation4], 1 }
 0x4a1   :  { %1536 = vsyncpa [#allocation4 + $0x1], 1 }

</bundles_post_ra>
